<compile_context>
chip_gen: v6e
topology: v6e:2x2x1
jax: 0.10.0
libtpu: 0.0.40
codegen_flags: <defaults>
</compile_context>

<pallas_src>
import jax
import jax.numpy as jnp
from jax.experimental import pallas as pl
from jax.experimental.pallas import tpu as pltpu


def _prelu(z, a):
    return jnp.maximum(z, 0.0) + a * jnp.minimum(z, 0.0)


def tac_kernel(alpha_ref,           # SMEM (3,)       : PReLU slopes a1, a2, a3
               x_ref,               # VMEM (Bb, M, Tt, C)
               w1_ref, b1_ref,      # VMEM (C, C), (1, C)      (W1^T)
               w23_ref, b2_ref,     # VMEM (C, 2C), (1, C)     ([W3a^T | W2^T])
               w3b_ref, b3_ref,     # VMEM (C, C), (1, C)      (W3b^T)
               o_ref):              # VMEM (Bb, M, Tt, C)
    a1 = alpha_ref[0]
    a2 = alpha_ref[1]
    a3 = alpha_ref[2]

    xb = x_ref[...]                               # (Bb, M, Tt, C), source dtype
    Bb, M, Tt, C = xb.shape
    xf = xb.reshape(Bb * M * Tt, C)               # leading-dim collapse only (no relayout)

    # lin1: Linear(c, c) + PReLU on every (batch, mic, frame) row.
    z1 = jnp.dot(xf, w1_ref[...], preferred_element_type=jnp.float32) + b1_ref[...]
    h0 = _prelu(z1, a1)                           # (N, C) f32

    # Fused GEMM: h0 @ [W3a^T | W2^T]  -> (N, 2C)
    g = jnp.dot(h0.astype(w23_ref.dtype), w23_ref[...],
                preferred_element_type=jnp.float32)
    ga = g[:, :C].reshape(Bb, M, Tt, C)           # h0 @ W3a^T
    gb = g[:, C:].reshape(Bb, M, Tt, C)           # h0 @ W2^T

    # lin2: mean over mics pushed past the GEMM (mean_m(h0) @ W2 == mean_m(h0 @ W2)).
    # Axis 1 is a leading (non-tiled) dim -> plain vreg adds on the VPU.
    z2 = jnp.mean(gb, axis=1) + b2_ref[...]       # (Bb, Tt, C)
    h1 = _prelu(z2, a2)

    # lin3 second half: + h1 @ W3b^T, broadcast over mics, bias, PReLU.
    z3b = jnp.dot(h1.reshape(Bb * Tt, C).astype(w3b_ref.dtype), w3b_ref[...],
                  preferred_element_type=jnp.float32).reshape(Bb, 1, Tt, C)
    z3 = ga + z3b + b3_ref[...]
    h3 = _prelu(z3, a3)                           # (Bb, M, Tt, C) f32

    # Residual in f32, then cast back to the source dtype.
    o_ref[...] = (xb.astype(jnp.float32) + h3).astype(o_ref.dtype)


def _divisors(n):
    return [d for d in range(1, n + 1) if n % d == 0]


def _pick_tiles(B, M, T, C, itemsize, budget_bytes):
    # Rough per-(b,m,t)-row VMEM cost: double-buffered in+out blocks in the
    # source dtype plus the f32 intermediates (h0, g=2C, z3/h3).
    per_row = C * (4 * itemsize + 32)
    t_cands = [d for d in _divisors(T) if d % 8 == 0] or [T]
    t_fit = [d for d in t_cands if M * d * per_row <= budget_bytes]
    Tt = max(t_fit) if t_fit else min(t_cands)
    b_fit = [d for d in _divisors(B) if d * M * Tt * per_row <= budget_bytes]
    Bb = max(b_fit) if b_fit else 1
    return Bb, Tt


def tac_forward_pallas(x, params, n_mic, *, vmem_block_budget=2 * 1024 * 1024):
    """x: ((b*m), t, c) -> ((b*m), t, c)"""
    BM, T, C = x.shape
    assert BM % n_mic == 0
    B = BM // n_mic
    dt = x.dtype
    x4 = x.reshape(B, n_mic, T, C)                 # metadata-only reshape

    Bb, Tt = _pick_tiles(B, n_mic, T, C, jnp.dtype(dt).itemsize, vmem_block_budget)

    # Pre-transpose weights so the kernel does row @ W (PyTorch Linear is x @ W^T + b).
    # Weights are kept in the activation dtype so bf16 inputs hit the MXU bf16 path.
    w1t = params["w1"].T.astype(dt)                    # (C, C)
    w2t = params["w2"].T.astype(dt)                    # (C, C)
    w3at = params["w3"][:, :C].T.astype(dt)            # (C, C) acts on h0
    w3bt = params["w3"][:, C:].T.astype(dt)            # (C, C) acts on h1
    w23 = jnp.concatenate([w3at, w2t], axis=1)         # (C, 2C) fused operand
    b1 = params["b1"].reshape(1, C).astype(jnp.float32)
    b2 = params["b2"].reshape(1, C).astype(jnp.float32)
    b3 = params["b3"].reshape(1, C).astype(jnp.float32)
    alphas = jnp.stack([params["a1"], params["a2"], params["a3"]]).astype(jnp.float32)

    grid = (B // Bb, T // Tt)

    out = pl.pallas_call(
        tac_kernel,
        out_shape=jax.ShapeDtypeStruct((B, n_mic, T, C), dt),
        grid=grid,
        in_specs=[
            pl.BlockSpec(memory_space=pltpu.MemorySpace.SMEM),               # alphas
            pl.BlockSpec((Bb, n_mic, Tt, C), lambda i, j: (i, 0, j, 0)),     # x
            pl.BlockSpec((C, C), lambda i, j: (0, 0)),                       # w1t
            pl.BlockSpec((1, C), lambda i, j: (0, 0)),                       # b1
            pl.BlockSpec((C, 2 * C), lambda i, j: (0, 0)),                   # w23
            pl.BlockSpec((1, C), lambda i, j: (0, 0)),                       # b2
            pl.BlockSpec((C, C), lambda i, j: (0, 0)),                       # w3bt
            pl.BlockSpec((1, C), lambda i, j: (0, 0)),                       # b3
        ],
        out_specs=pl.BlockSpec((Bb, n_mic, Tt, C), lambda i, j: (i, 0, j, 0)),
        compiler_params=pltpu.CompilerParams(
            dimension_semantics=("parallel", "parallel"),
            vmem_limit_bytes=32 * 1024 * 1024,
        ),
    )(alphas, x4, w1t, b1, w23, b2, w3bt, b3)

    return out.reshape(BM, T, C)


def tac_forward_ref(x, params, n_mic):
    """Pure-JAX reference mirroring the PyTorch forward exactly."""
    BM, T, C = x.shape
    B = BM // n_mic
    x4 = x.reshape(B, n_mic, T, C).astype(jnp.float32)

    def prelu(z, a):
        return jnp.where(z >= 0, z, a * z)

    h0 = prelu(jnp.einsum("bmtc,dc->bmtd", x4, params["w1"]) + params["b1"], params["a1"])
    m = jnp.mean(h0, axis=1)                                            # (B, T, C)
    h1b = prelu(jnp.einsum("btc,dc->btd", m, params["w2"]) + params["b2"], params["a2"])
    h1 = jnp.broadcast_to(h1b[:, None, :, :], h0.shape)
    cat = jnp.concatenate([h0, h1], axis=-1)                            # (B, M, T, 2C)
    h3 = prelu(jnp.einsum("bmtc,dc->bmtd", cat, params["w3"]) + params["b3"], params["a3"])
    return (x4 + h3).reshape(BM, T, C).astype(x.dtype)


if __name__ == "__main__":
    # Small shapes: batch=2, n_mic=4, seq(t)=16, input_dim(c)=32
    B, M, T, C = 2, 4, 16, 32
    key = jax.random.PRNGKey(0)
    kx, k1, k2, k3, kb1, kb2, kb3 = jax.random.split(key, 7)

    x = jax.random.normal(kx, (B * M, T, C), dtype=jnp.float32)

    params = {
        # nn.Linear(C, C): weight (C, C), bias (C,)
        "w1": 0.1 * jax.random.normal(k1, (C, C), dtype=jnp.float32),
        "b1": 0.1 * jax.random.normal(kb1, (C,), dtype=jnp.float32),
        "w2": 0.1 * jax.random.normal(k2, (C, C), dtype=jnp.float32),
        "b2": 0.1 * jax.random.normal(kb2, (C,), dtype=jnp.float32),
        # nn.Linear(2C, C): weight (C, 2C), bias (C,)
        "w3": 0.1 * jax.random.normal(k3, (C, 2 * C), dtype=jnp.float32),
        "b3": 0.1 * jax.random.normal(kb3, (C,), dtype=jnp.float32),
        # PReLU default single learnable slope = 0.25
        "a1": jnp.float32(0.25),
        "a2": jnp.float32(0.25),
        "a3": jnp.float32(0.25),
    }

    y = tac_forward_pallas(x, params, n_mic=M)
    y = jax.block_until_ready(y)

    y_ref = tac_forward_ref(x, params, n_mic=M)
    assert y.shape == (B * M, T, C)
    # Tolerance covers the FP reassociation from fusing mean_m(.)@W2 into the GEMM.
    assert jnp.allclose(y, y_ref, rtol=1e-4, atol=1e-4), "Pallas output mismatch vs reference"

    print("KERNEL_OK")
</pallas_src>

<mosaic_0001>
module attributes {stable_mosaic.version = 11 : i64} {
  func.func @tac_kernel(%arg0: i32, %arg1: i32, %arg2: memref<3xf32, #tpu.memory_space<smem>>, %arg3: memref<2x4x16x32xf32, #tpu.memory_space<vmem>>, %arg4: memref<32x32xf32, #tpu.memory_space<vmem>>, %arg5: memref<1x32xf32, #tpu.memory_space<vmem>>, %arg6: memref<32x64xf32, #tpu.memory_space<vmem>>, %arg7: memref<1x32xf32, #tpu.memory_space<vmem>>, %arg8: memref<32x32xf32, #tpu.memory_space<vmem>>, %arg9: memref<1x32xf32, #tpu.memory_space<vmem>>, %arg10: memref<2x4x16x32xf32, #tpu.memory_space<vmem>>) attributes {dimension_semantics = [#tpu.dimension_semantics<parallel>, #tpu.dimension_semantics<parallel>], iteration_bounds = array<i64: 1, 1>, scalar_prefetch = 0 : i64, scratch_operands = 0 : i64, tpu.core_type = #tpu.core_type<tc>, window_params = [{transform_indices = @transform_0, window_bounds = array<i64: 3>}, {transform_indices = @transform_1, window_bounds = array<i64: 2, 4, 16, 32>}, {pipeline_mode = #tpu.pipeline_mode<synchronous>, transform_indices = @transform_2, window_bounds = array<i64: 32, 32>}, {pipeline_mode = #tpu.pipeline_mode<synchronous>, transform_indices = @transform_3, window_bounds = array<i64: 1, 32>}, {pipeline_mode = #tpu.pipeline_mode<synchronous>, transform_indices = @transform_4, window_bounds = array<i64: 32, 64>}, {pipeline_mode = #tpu.pipeline_mode<synchronous>, transform_indices = @transform_5, window_bounds = array<i64: 1, 32>}, {pipeline_mode = #tpu.pipeline_mode<synchronous>, transform_indices = @transform_6, window_bounds = array<i64: 32, 32>}, {pipeline_mode = #tpu.pipeline_mode<synchronous>, transform_indices = @transform_7, window_bounds = array<i64: 1, 32>}, {transform_indices = @transform_8, window_bounds = array<i64: 2, 4, 16, 32>}]} {
    %c0 = arith.constant 0 : index
    %0 = memref.load %arg2[%c0] : memref<3xf32, #tpu.memory_space<smem>>
    %c1 = arith.constant 1 : index
    %1 = memref.load %arg2[%c1] : memref<3xf32, #tpu.memory_space<smem>>
    %c2 = arith.constant 2 : index
    %2 = memref.load %arg2[%c2] : memref<3xf32, #tpu.memory_space<smem>>
    %c0_0 = arith.constant 0 : index
    %c0_1 = arith.constant 0 : index
    %c0_2 = arith.constant 0 : index
    %c0_3 = arith.constant 0 : index
    %3 = vector.load %arg3[%c0_0, %c0_1, %c0_2, %c0_3] : memref<2x4x16x32xf32, #tpu.memory_space<vmem>>, vector<2x4x16x32xf32>
    %4 = vector.shape_cast %3 : vector<2x4x16x32xf32> to vector<128x32xf32>
    %c0_4 = arith.constant 0 : index
    %c0_5 = arith.constant 0 : index
    %5 = vector.load %arg4[%c0_4, %c0_5] : memref<32x32xf32, #tpu.memory_space<vmem>>, vector<32x32xf32>
    %cst = arith.constant dense<0.000000e+00> : vector<128x32xf32>
    %6 = tpu.matmul %4, %5, %cst {dimension_numbers = #tpu.dot_dimension_numbers<[1], [0], [0], [1], [0, 0, 1, 1], [], []>} : vector<128x32xf32>, vector<32x32xf32>, vector<128x32xf32> -> vector<128x32xf32>
    %c0_6 = arith.constant 0 : index
    %c0_7 = arith.constant 0 : index
    %7 = vector.load %arg5[%c0_6, %c0_7] : memref<1x32xf32, #tpu.memory_space<vmem>>, vector<1x32xf32>
    %8 = vector.broadcast %7 : vector<1x32xf32> to vector<128x32xf32>
    %9 = arith.addf %6, %8 : vector<128x32xf32>
    %cst_8 = arith.constant 0.000000e+00 : f32
    %10 = vector.broadcast %cst_8 : f32 to vector<128x32xf32>
    %11 = arith.maximumf %9, %10 : vector<128x32xf32>
    %cst_9 = arith.constant 0.000000e+00 : f32
    %12 = vector.broadcast %cst_9 : f32 to vector<128x32xf32>
    %13 = arith.minimumf %9, %12 : vector<128x32xf32>
    %14 = vector.broadcast %0 : f32 to vector<128x32xf32>
    %15 = arith.mulf %14, %13 : vector<128x32xf32>
    %16 = arith.addf %11, %15 : vector<128x32xf32>
    %c0_10 = arith.constant 0 : index
    %c0_11 = arith.constant 0 : index
    %17 = vector.load %arg6[%c0_10, %c0_11] : memref<32x64xf32, #tpu.memory_space<vmem>>, vector<32x64xf32>
    %cst_12 = arith.constant dense<0.000000e+00> : vector<128x64xf32>
    %18 = tpu.matmul %16, %17, %cst_12 {dimension_numbers = #tpu.dot_dimension_numbers<[1], [0], [0], [1], [0, 0, 1, 1], [], []>} : vector<128x32xf32>, vector<32x64xf32>, vector<128x64xf32> -> vector<128x64xf32>
    %19 = vector.extract_strided_slice %18 {offsets = [0, 0], sizes = [128, 32], strides = [1, 1]} : vector<128x64xf32> to vector<128x32xf32>
    %20 = vector.shape_cast %19 : vector<128x32xf32> to vector<2x4x16x32xf32>
    %21 = vector.extract_strided_slice %18 {offsets = [0, 32], sizes = [128, 32], strides = [1, 1]} : vector<128x64xf32> to vector<128x32xf32>
    %22 = vector.shape_cast %21 : vector<128x32xf32> to vector<2x4x16x32xf32>
    %cst_13 = arith.constant dense<0.000000e+00> : vector<2x16x32xf32>
    %23 = vector.multi_reduction <add>, %22, %cst_13 [1] : vector<2x4x16x32xf32> to vector<2x16x32xf32>
    %cst_14 = arith.constant 4.000000e+00 : f32
    %24 = vector.broadcast %cst_14 : f32 to vector<2x16x32xf32>
    %25 = arith.divf %23, %24 : vector<2x16x32xf32>
    %c0_15 = arith.constant 0 : index
    %c0_16 = arith.constant 0 : index
    %26 = vector.load %arg7[%c0_15, %c0_16] : memref<1x32xf32, #tpu.memory_space<vmem>>, vector<1x32xf32>
    %27 = vector.shape_cast %26 : vector<1x32xf32> to vector<1x1x32xf32>
    %28 = vector.broadcast %27 : vector<1x1x32xf32> to vector<2x16x32xf32>
    %29 = arith.addf %25, %28 : vector<2x16x32xf32>
    %cst_17 = arith.constant 0.000000e+00 : f32
    %30 = vector.broadcast %cst_17 : f32 to vector<2x16x32xf32>
    %31 = arith.maximumf %29, %30 : vector<2x16x32xf32>
    %cst_18 = arith.constant 0.000000e+00 : f32
    %32 = vector.broadcast %cst_18 : f32 to vector<2x16x32xf32>
    %33 = arith.minimumf %29, %32 : vector<2x16x32xf32>
    %34 = vector.broadcast %1 : f32 to vector<2x16x32xf32>
    %35 = arith.mulf %34, %33 : vector<2x16x32xf32>
    %36 = arith.addf %31, %35 : vector<2x16x32xf32>
    %37 = vector.shape_cast %36 : vector<2x16x32xf32> to vector<32x32xf32>
    %c0_19 = arith.constant 0 : index
    %c0_20 = arith.constant 0 : index
    %38 = vector.load %arg8[%c0_19, %c0_20] : memref<32x32xf32, #tpu.memory_space<vmem>>, vector<32x32xf32>
    %cst_21 = arith.constant dense<0.000000e+00> : vector<32x32xf32>
    %39 = tpu.matmul %37, %38, %cst_21 {dimension_numbers = #tpu.dot_dimension_numbers<[1], [0], [0], [1], [0, 0, 1, 1], [], []>} : vector<32x32xf32>, vector<32x32xf32>, vector<32x32xf32> -> vector<32x32xf32>
    %40 = vector.shape_cast %39 : vector<32x32xf32> to vector<2x1x16x32xf32>
    %41 = vector.broadcast %40 : vector<2x1x16x32xf32> to vector<2x4x16x32xf32>
    %42 = arith.addf %20, %41 : vector<2x4x16x32xf32>
    %c0_22 = arith.constant 0 : index
    %c0_23 = arith.constant 0 : index
    %43 = vector.load %arg9[%c0_22, %c0_23] : memref<1x32xf32, #tpu.memory_space<vmem>>, vector<1x32xf32>
    %44 = vector.shape_cast %43 : vector<1x32xf32> to vector<1x1x1x32xf32>
    %45 = vector.broadcast %44 : vector<1x1x1x32xf32> to vector<2x4x16x32xf32>
    %46 = arith.addf %42, %45 : vector<2x4x16x32xf32>
    %cst_24 = arith.constant 0.000000e+00 : f32
    %47 = vector.broadcast %cst_24 : f32 to vector<2x4x16x32xf32>
    %48 = arith.maximumf %46, %47 : vector<2x4x16x32xf32>
    %cst_25 = arith.constant 0.000000e+00 : f32
    %49 = vector.broadcast %cst_25 : f32 to vector<2x4x16x32xf32>
    %50 = arith.minimumf %46, %49 : vector<2x4x16x32xf32>
    %51 = vector.broadcast %2 : f32 to vector<2x4x16x32xf32>
    %52 = arith.mulf %51, %50 : vector<2x4x16x32xf32>
    %53 = arith.addf %48, %52 : vector<2x4x16x32xf32>
    %54 = arith.addf %3, %53 : vector<2x4x16x32xf32>
    %c0_26 = arith.constant 0 : index
    %c0_27 = arith.constant 0 : index
    %c0_28 = arith.constant 0 : index
    %c0_29 = arith.constant 0 : index
    %55 = vector.load %arg10[%c0_26, %c0_27, %c0_28, %c0_29] : memref<2x4x16x32xf32, #tpu.memory_space<vmem>>, vector<2x4x16x32xf32>
    tpu.vector_store %arg10[%c0_26, %c0_27, %c0_28, %c0_29], %54 {strides = array<i32>} : memref<2x4x16x32xf32, #tpu.memory_space<vmem>>, vector<2x4x16x32xf32>,
    return
  }
  func.func @transform_0(%arg0: i32, %arg1: i32) -> i32 {
    %c0_i32 = arith.constant 0 : i32
    %c0_i32_0 = arith.constant 0 : i32
    return %c0_i32 : i32
  }
  func.func @transform_1(%arg0: i32, %arg1: i32) -> (i32, i32, i32, i32) {
    %c0_i32 = arith.constant 0 : i32
    %c0_i32_0 = arith.constant 0 : i32
    %c0_i32_1 = arith.constant 0 : i32
    return %arg0, %c0_i32, %arg1, %c0_i32_0 : i32, i32, i32, i32
  }
  func.func @transform_2(%arg0: i32, %arg1: i32) -> (i32, i32) {
    %c0_i32 = arith.constant 0 : i32
    %c0_i32_0 = arith.constant 0 : i32
    %c0_i32_1 = arith.constant 0 : i32
    return %c0_i32, %c0_i32_0 : i32, i32
  }
  func.func @transform_3(%arg0: i32, %arg1: i32) -> (i32, i32) {
    %c0_i32 = arith.constant 0 : i32
    %c0_i32_0 = arith.constant 0 : i32
    %c0_i32_1 = arith.constant 0 : i32
    return %c0_i32, %c0_i32_0 : i32, i32
  }
  func.func @transform_4(%arg0: i32, %arg1: i32) -> (i32, i32) {
    %c0_i32 = arith.constant 0 : i32
    %c0_i32_0 = arith.constant 0 : i32
    %c0_i32_1 = arith.constant 0 : i32
    return %c0_i32, %c0_i32_0 : i32, i32
  }
  func.func @transform_5(%arg0: i32, %arg1: i32) -> (i32, i32) {
    %c0_i32 = arith.constant 0 : i32
    %c0_i32_0 = arith.constant 0 : i32
    %c0_i32_1 = arith.constant 0 : i32
    return %c0_i32, %c0_i32_0 : i32, i32
  }
  func.func @transform_6(%arg0: i32, %arg1: i32) -> (i32, i32) {
    %c0_i32 = arith.constant 0 : i32
    %c0_i32_0 = arith.constant 0 : i32
    %c0_i32_1 = arith.constant 0 : i32
    return %c0_i32, %c0_i32_0 : i32, i32
  }
  func.func @transform_7(%arg0: i32, %arg1: i32) -> (i32, i32) {
    %c0_i32 = arith.constant 0 : i32
    %c0_i32_0 = arith.constant 0 : i32
    %c0_i32_1 = arith.constant 0 : i32
    return %c0_i32, %c0_i32_0 : i32, i32
  }
  func.func @transform_8(%arg0: i32, %arg1: i32) -> (i32, i32, i32, i32) {
    %c0_i32 = arith.constant 0 : i32
    %c0_i32_0 = arith.constant 0 : i32
    %c0_i32_1 = arith.constant 0 : i32
    return %arg0, %c0_i32, %arg1, %c0_i32_0 : i32, i32, i32, i32
  }
}

</mosaic_0001>

<bundles_post_ra>
// kernel: tpu_custom_call.1
= control target key start
LH: loop header
LB: loop body
LE: loop exit
PB: predicated region body
PF: predicated region fallthrough
CT: control target
= control target key end

     0   :  { %13 = vsyncpa [#allocation5], 0  ;;  %s1563_s0 = inlined_call_operand.hbm [shape: f32[3], index: 0, kind: input, shape index: {}]   ;;  %s1564_s1 = inlined_call_operand.hbm [shape: f32[2,4,16,32], index: 1, kind: input, shape index: {}]   ;;  %s1565_s2 = inlined_call_operand.hbm [shape: f32[32,32], index: 2, kind: input, shape index: {}]   ;;  %s1566_s3 = inlined_call_operand.vmem [shape: f32[1,32], index: 3, kind: input, shape index: {}]   ;;  %s1567_s4 = inlined_call_operand.hbm [shape: f32[32,64], index: 4, kind: input, shape index: {}]   ;;  %s1568_s5 = inlined_call_operand.vmem [shape: f32[1,32], index: 5, kind: input, shape index: {}]   ;;  %s1569_s6 = inlined_call_operand.hbm [shape: f32[32,32], index: 6, kind: input, shape index: {}]   ;;  %s1570_s7 = inlined_call_operand.vmem [shape: f32[1,32], index: 7, kind: input, shape index: {}]   ;;  %s1571_s8 = inlined_call_operand.hbm [shape: f32[2,4,16,32], index: 8, kind: output, shape index: {}]  }
   0x1   :  { %14 = vsyncpa [#allocation3], 0 }
   0x2   :  { %15 = vsyncpa [#allocation8], 0 }
   0x3   :  { %16 = vsyncpa [#allocation11], 0 }
   0x4   :  { %17 = vsyncpa [#allocation4], 0  ;;  %s1214_s27 = smov [#allocation7]   ;;  %s1215_s29 = smov [#allocation6]  }
   0x5   :  { %s43_s28 = sshll.u32 %s1214_s27, 4  ;;  %s31_s30 = sshll.u32 %s1215_s29, 4  ;;  %s44_s28 = int_to_ptr.vmem [resolvable:$true] %s43_s28  ;;  %s32_s30 = int_to_ptr.vmem [resolvable:$true] %s31_s30 }
   0x6   :  { %s1104_s9 = scalar_lea.vmem %s44_s28, 512  ;;  %p1109_p1 = scmp.lt.s32.totalorder %s44_s28, %s44_s28 }
   0x7   :  { %p1105_p0 = scmp.ne.s32.totalorder %s44_s28, %s1104_s9  ;;  %p1110_p2 = scmp.lt.s32.totalorder %s1104_s9, %s1104_s9 }
   0x9   :  { %p1111_p3 = por %p1110_p2, %p1109_p1 }
   0xb   :  { %p1112_p4 = pnand %p1111_p3, %p1105_p0 }
   0xd   :  { %1115 = shalt.err (!%p1112_p4)
}
   0xe   :  { %s1216_s10 = smov 128   ;;  %s1217_s11 = smov 8  }
   0xf   :  { %49 = dma.hbm_to_vmem [thread:$0]  %s1565_s2, 512, %s44_s28, [#allocation8], %s1216_s10, %s1216_s10, %s1217_s11  }
  0x10   :  { %s1218_s14 = smov [#allocation2]   ;;  %s1132_s17 = scalar_lea.vmem %s32_s30, 2048 }
  0x11   :  { %25 = dma.hbm_to_smem %s1563_s0, 16, %s1218_s14, [#allocation5]  }
  0x12   :  { %p1133_p5 = scmp.ne.s32.totalorder %s32_s30, %s1132_s17  ;;  %p1137_p6 = scmp.lt.s32.totalorder %s32_s30, %s32_s30 }
  0x13   :  { %p1138_p7 = scmp.lt.s32.totalorder %s1132_s17, %s1132_s17 }
  0x15   :  { %p1139_p8 = por %p1138_p7, %p1137_p6 }
  0x17   :  { %p1140_p9 = pnand %p1139_p8, %p1133_p5 }
  0x19   :  { %1143 = shalt.err (!%p1140_p9)
}
  0x1a   :  { %37 = dma.hbm_to_vmem [thread:$0]  %s1564_s1, 2048, %s32_s30, [#allocation3], %s1216_s10, %s1216_s10, %s1217_s11  }
  0x1b   :  { %s1219_s2 = smov [#allocation9]   ;;  %s1220_s21 = smov [#allocation10]  }
  0x1c   :  { %s57_s20 = sshll.u32 %s1219_s2, 4  ;;  %s71_s0 = sshll.u32 %s1220_s21, 4  ;;  %s58_s20 = int_to_ptr.vmem [resolvable:$true] %s57_s20  ;;  %s72_s0 = int_to_ptr.vmem [resolvable:$true] %s71_s0 }
  0x1d   :  { %s1152_s22 = scalar_lea.vmem %s58_s20, 512  ;;  %p1157_p11 = scmp.lt.s32.totalorder %s58_s20, %s58_s20 }
  0x1e   :  { %p1153_p10 = scmp.ne.s32.totalorder %s58_s20, %s1152_s22  ;;  %p1158_p12 = scmp.lt.s32.totalorder %s1152_s22, %s1152_s22 }
  0x20   :  { %p1159_p13 = por %p1158_p12, %p1157_p11 }
  0x22   :  { %p1160_p0 = pnand %p1159_p13, %p1153_p10 }
  0x24   :  { %1163 = shalt.err (!%p1160_p0)
}
  0x25   :  { %63 = dma.hbm_to_vmem [thread:$0]  %s1567_s4, 512, %s58_s20, [#allocation8], %s1216_s10, %s1216_s10, %s1217_s11  }
  0x26   :  { %s1172_s1 = scalar_lea.vmem %s72_s0, 512  ;;  %p1177_p2 = scmp.lt.s32.totalorder %s72_s0, %s72_s0 }
  0x27   :  { %p1173_p1 = scmp.ne.s32.totalorder %s72_s0, %s1172_s1  ;;  %p1178_p3 = scmp.lt.s32.totalorder %s1172_s1, %s1172_s1 }
  0x29   :  { %p1179_p4 = por %p1178_p3, %p1177_p2 }
  0x2b   :  { %p1180_p5 = pnand %p1179_p4, %p1173_p1 }
  0x2d   :  { %1183 = shalt.err (!%p1180_p5)
}
  0x2e   :  { %77 = dma.hbm_to_vmem [thread:$0]  %s1569_s6, 512, %s72_s0, [#allocation11], %s1216_s10, %s1216_s10, %s1217_s11  }
  0x2f   :  { %1204 = dma.done.wait [#allocation5], 16  }
  0x30   :  { %1205 = vsyncadd [#allocation5], 4294967280 }
  0x31   :  { %1206 = dma.done.wait [#allocation3], 2048  }
  0x32   :  { %1207 = vsyncadd [#allocation3], 4294965248 }
  0x33   :  { %1208 = dma.done.wait [#allocation8], 1024  }
  0x34   :  { %1209 = vsyncadd [#allocation8], 4294966272 }
  0x35   :  { %1210 = dma.done.wait [#allocation11], 512  }
  0x36   :  { %1211 = vsyncadd [#allocation11], 4294966784 }
  0x37   :  { %95 = sfence }
  0x38   :  { %v118_v0 = vld [vmem:[#allocation7 + $0x18] sm:$0xff]  ;;  %v117_v1 = vld [vmem:[#allocation7 + $0x10] sm:$0xff]  ;;  %vm126_vm0 = vcmask 261120   ;;  %v1296_v2 = vld [vmem:[#allocation6] sm:$0xff]  ;;  %s1221_s27 = smov 32   ;;  %s96_s28 = sld [smem:[#allocation2]] }
  0x39   :  { %1000 = vmatprep.subr.mxu0 %v118_v0  ;;  %v116_v3 = vld [vmem:[#allocation7 + $0x8] sm:$0xff]  ;;  %1008 = vmatprep.mubr.msk.f32.mxu0 %vm126_vm0, %v1296_v2  ;;  %v115_v4 = vld [vmem:[#allocation7] sm:$0xff]  ;;  %v1302_v6 = vld [vmem:[#allocation6 + $0x10] sm:$0xff]  ;;  %vm582_vm1 = vcmask 523520   ;;  %s912_s9 = sld [smem:[#allocation2 + $0x2]] }
  0x3a   :  { %1001 = vmatpush3.msra.mxu0 %v118_v0  ;;  %v1300_v5 = vld [vmem:[#allocation6 + $0x8] sm:$0xff]  ;;  %v1308_v7 = vld [vmem:[#allocation6 + $0x18] sm:$0xff]  ;;  %v1310_v8 = vld [vmem:[#allocation6 + $0x20] sm:$0xff] }
  0x3b   :  { %1002 = vmatprep.subr.mxu0 %v117_v1  ;;  %v1316_v9 = vld [vmem:[#allocation6 + $0x28] sm:$0xff]  ;;  %v1318_v10 = vld [vmem:[#allocation6 + $0x30] sm:$0xff]  ;;  %v1324_v11 = vld [vmem:[#allocation6 + $0x38] sm:$0xff] }
  0x3c   :  { %1003 = vmatpush3.msra.mxu0 %v117_v1  ;;  %v1326_v12 = vld [vmem:[#allocation6 + $0x40] sm:$0xff]  ;;  %v1332_v13 = vld [vmem:[#allocation6 + $0x48] sm:$0xff]  ;;  %v1334_v14 = vld [vmem:[#allocation6 + $0x50] sm:$0xff] }
  0x3d   :  { %1004 = vmatprep.subr.mxu0 %v116_v3  ;;  %v1340_v15 = vld [vmem:[#allocation6 + $0x58] sm:$0xff]  ;;  %v1342_v16 = vld [vmem:[#allocation6 + $0x60] sm:$0xff]  ;;  %v1348_v17 = vld [vmem:[#allocation6 + $0x68] sm:$0xff] }
  0x3e   :  { %1005 = vmatpush3.msra.mxu0 %v116_v3  ;;  %v1350_v18 = vld [vmem:[#allocation6 + $0x70] sm:$0xff]  ;;  %v1356_v19 = vld [vmem:[#allocation6 + $0x78] sm:$0xff]  ;;  %v386_v22 = vld [vmem:[#allocation9 + $0x8] sm:$0xff]  ;;  %v1369_v30 = vstv %s96_s28 }
  0x3f   :  { %1006 = vmatprep.subr.mxu0 %v115_v4  ;;  %v388_v20 = vld [vmem:[#allocation9 + $0x18] sm:$0xff]  ;;  %v387_v21 = vld [vmem:[#allocation9 + $0x10] sm:$0xff]  ;;  %v385_v23 = vld [vmem:[#allocation9] sm:$0xff] }
  0x40   :  { %1007 = vmatpush3.msra.mxu0 %v115_v4  ;;  %1032 = vmatprep.subr.mxu1 %v388_v20  ;;  %v946_v24 = vld [vmem:[%s1568_s5] ss:$0 sm:$0xff]  ;;  %s1222_s5 = smov 96  }
  0x41   :  { %1009 = vmatmul.mubr.msk.f32.vlgmr.msra.gmra.mxu0 %vm126_vm0, %v1300_v5  ;;  %1033 = vmatpush3.msra.mxu1 %v388_v20  ;;  %v1366_v25 = vld [vmem:[%s1566_s3] ss:$0 sm:$0xff]  ;;  %s911_s3 = sld [smem:[#allocation2 + $0x1]] }
  0x42   :  { %1011 = vmatprep.mubr.msk.f32.mxu0 %vm126_vm0, %v1302_v6  ;;  %1034 = vmatprep.subr.mxu1 %v387_v21 }
  0x43   :  { %1035 = vmatpush3.msra.mxu1 %v387_v21  ;;  %622 = vrot.lane.b32.xlu0 %v946_v24, %s1221_s27 }
  0x44   :  { %1036 = vmatprep.subr.mxu1 %v386_v22 }
  0x45   :  { %1012 = vmatmul.mubr.msk.f32.gmra.mxu0 %vm126_vm0, %v1308_v7  ;;  %1037 = vmatpush3.msra.mxu1 %v386_v22 }
  0x46   :  { %1014 = vmatprep.mubr.msk.f32.mxu0 %vm126_vm0, %v1310_v8  ;;  %1038 = vmatprep.subr.mxu1 %v385_v23 }
  0x47   :  { %1039 = vmatpush3.msra.mxu1 %v385_v23 }
  0x49   :  { %1015 = vmatmul.mubr.msk.f32.gmra.mxu0 %vm126_vm0, %v1316_v9 }
  0x4a   :  { %1017 = vmatprep.mubr.msk.f32.mxu0 %vm126_vm0, %v1318_v10 }
  0x4d   :  { %1018 = vmatmul.mubr.msk.f32.gmra.mxu0 %vm126_vm0, %v1324_v11 }
  0x4e   :  { %1020 = vmatprep.mubr.msk.f32.mxu0 %vm126_vm0, %v1326_v12 }
  0x51   :  { %1021 = vmatmul.mubr.msk.f32.gmra.mxu0 %vm126_vm0, %v1332_v13 }
  0x52   :  { %1023 = vmatprep.mubr.msk.f32.mxu0 %vm126_vm0, %v1334_v14 }
  0x55   :  { %1024 = vmatmul.mubr.msk.f32.gmra.mxu0 %vm126_vm0, %v1340_v15 }
  0x56   :  { %1026 = vmatprep.mubr.msk.f32.mxu0 %vm126_vm0, %v1342_v16 }
  0x59   :  { %1027 = vmatmul.mubr.msk.f32.gmra.mxu0 %vm126_vm0, %v1348_v17 }
  0x5a   :  { %1029 = vmatprep.mubr.msk.f32.mxu0 %vm126_vm0, %v1350_v18 }
  0x5d   :  { %1030 = vmatmul.mubr.msk.f32.gmra.mxu0 %vm126_vm0, %v1356_v19 }
 0x101   :  { %v1010_v26 = vpop.f32.mrf.mxu0 }
 0x102   :  { %v247_v27 = vadd.f32 %v1010_v26, %v1366_v25 }
 0x103   :  { %v241_v28 = vpop.f32.mrf.mxu0 }
 0x104   :  { %v337_v29 = vmin.f32 %v247_v27, 0.0  ;;  %v242_v31 = vadd.f32 %v1366_v25, %v241_v28  ;;  %v321_v39 = vmax.f32 %v247_v27, 0.0 }
 0x105   :  { %v1013_v32 = vpop.f32.mrf.mxu0 }
 0x106   :  { %v336_v33 = vmin.f32 %v242_v31, 0.0  ;;  %v257_v34 = vadd.f32 %v1013_v32, %v1366_v25  ;;  %v354_v35 = vmul.f32 %v1369_v30, %v337_v29  ;;  %v320_v40 = vmax.f32 %v242_v31, 0.0 }
 0x107   :  { %v251_v36 = vpop.f32.mrf.mxu0 }
 0x108   :  { %v339_v37 = vmin.f32 %v257_v34, 0.0  ;;  %v252_v38 = vadd.f32 %v1366_v25, %v251_v36  ;;  %v353_v42 = vmul.f32 %v1369_v30, %v336_v33  ;;  %v370_v45 = vadd.f32 %v354_v35, %v321_v39 }
 0x109   :  { %v1016_v41 = vpop.f32.mrf.mxu0  ;;  %v323_v54 = vmax.f32 %v257_v34, 0.0 }
 0x10a   :  { %v338_v43 = vmin.f32 %v252_v38, 0.0  ;;  %v267_v44 = vadd.f32 %v1016_v41, %v1366_v25  ;;  %v369_v47 = vadd.f32 %v353_v42, %v320_v40  ;;  %v356_v48 = vmul.f32 %v1369_v30, %v339_v37 }
 0x10b   :  { %v261_v46 = vpop.f32.mrf.mxu0  ;;  %v322_v49 = vmax.f32 %v252_v38, 0.0 }
 0x10c   :  { %v355_v50 = vmul.f32 %v1369_v30, %v338_v43  ;;  %v341_v51 = vmin.f32 %v267_v44, 0.0  ;;  %v262_v52 = vadd.f32 %v1366_v25, %v261_v46  ;;  %1040 = vmatprep.mubr.msk.f32.mxu1 %vm126_vm0, %v369_v47  ;;  %v372_v60 = vadd.f32 %v356_v48, %v323_v54 }
 0x10d   :  { %v1019_v53 = vpop.f32.mrf.mxu0  ;;  %1041 = vmatmul.mubr.msk.f32.vlgmr.msra.gmra.mxu1 %vm126_vm0, %v370_v45  ;;  %v325_v63 = vmax.f32 %v267_v44, 0.0 }
 0x10e   :  { %v371_v55 = vadd.f32 %v355_v50, %v322_v49  ;;  %v277_v56 = vadd.f32 %v1019_v53, %v1366_v25  ;;  %v358_v57 = vmul.f32 %v1369_v30, %v341_v51  ;;  %v340_v58 = vmin.f32 %v262_v52, 0.0 }
 0x10f   :  { %v271_v59 = vpop.f32.mrf.mxu0  ;;  %v324_v0 = vmax.f32 %v262_v52, 0.0 }
 0x110   :  { %v343_v61 = vmin.f32 %v277_v56, 0.0  ;;  %v272_v62 = vadd.f32 %v1366_v25, %v271_v59  ;;  %1043 = vmatprep.mubr.msk.f32.mxu1 %vm126_vm0, %v371_v55  ;;  %v357_v1 = vmul.f32 %v1369_v30, %v340_v58  ;;  %v374_v21 = vadd.f32 %v358_v57, %v325_v63 }
 0x111   :  { %v1022_v3 = vpop.f32.mrf.mxu0  ;;  %1044 = vmatmul.mubr.msk.f32.gmra.mxu1 %vm126_vm0, %v372_v60  ;;  %v327_v32 = vmax.f32 %v277_v56, 0.0 }
 0x112   :  { %v342_v4 = vmin.f32 %v272_v62, 0.0  ;;  %v287_v20 = vadd.f32 %v1022_v3, %v1366_v25  ;;  %v373_v22 = vadd.f32 %v357_v1, %v324_v0  ;;  %v360_v24 = vmul.f32 %v1369_v30, %v343_v61 }
 0x113   :  { %v281_v23 = vpop.f32.mrf.mxu0  ;;  %v326_v26 = vmax.f32 %v272_v62, 0.0 }
 0x114   :  { %v359_v27 = vmul.f32 %v1369_v30, %v342_v4  ;;  %v345_v28 = vmin.f32 %v287_v20, 0.0  ;;  %v282_v29 = vadd.f32 %v1366_v25, %v281_v23  ;;  %1046 = vmatprep.mubr.msk.f32.mxu1 %vm126_vm0, %v373_v22  ;;  %v376_v38 = vadd.f32 %v360_v24, %v327_v32 }
 0x115   :  { %v1025_v31 = vpop.f32.mrf.mxu0  ;;  %1047 = vmatmul.mubr.msk.f32.gmra.mxu1 %vm126_vm0, %v374_v21  ;;  %v329_v41 = vmax.f32 %v287_v20, 0.0 }
 0x116   :  { %v375_v33 = vadd.f32 %v359_v27, %v326_v26  ;;  %v297_v34 = vadd.f32 %v1025_v31, %v1366_v25  ;;  %v362_v35 = vmul.f32 %v1369_v30, %v345_v28  ;;  %v344_v36 = vmin.f32 %v282_v29, 0.0  ;;  %v648_v31 = vld [vmem:[#allocation10 + $0x10] sm:$0xff] }
 0x117   :  { %v291_v37 = vpop.f32.mrf.mxu0  ;;  %v328_v42 = vmax.f32 %v282_v29, 0.0  ;;  %v649_v29 = vld [vmem:[#allocation10 + $0x18] sm:$0xff] }
 0x118   :  { %v347_v39 = vmin.f32 %v297_v34, 0.0  ;;  %v292_v40 = vadd.f32 %v1366_v25, %v291_v37  ;;  %1049 = vmatprep.mubr.msk.f32.mxu1 %vm126_vm0, %v375_v33  ;;  %v361_v43 = vmul.f32 %v1369_v30, %v344_v36  ;;  %v378_v47 = vadd.f32 %v362_v35, %v329_v41  ;;  %1064 = vmatprep.subr.mxu0 %v649_v29 }
 0x119   :  { %v1028_v44 = vpop.f32.mrf.mxu0  ;;  %1050 = vmatmul.mubr.msk.f32.gmra.mxu1 %vm126_vm0, %v376_v38  ;;  %v331_v56 = vmax.f32 %v297_v34, 0.0  ;;  %1078 = vmatprep.subr.mxu1 %v649_v29 }
 0x11a   :  { %v346_v45 = vmin.f32 %v292_v40, 0.0  ;;  %v307_v46 = vadd.f32 %v1028_v44, %v1366_v25  ;;  %v377_v48 = vadd.f32 %v361_v43, %v328_v42  ;;  %v364_v50 = vmul.f32 %v1369_v30, %v347_v39  ;;  %1065 = vmatpush3.msra.mxu0 %v649_v29  ;;  %1082 = vmatpush3.msra.mxu1 %v649_v29 }
 0x11b   :  { %v301_v49 = vpop.f32.mrf.mxu0  ;;  %v330_v51 = vmax.f32 %v292_v40, 0.0  ;;  %1066 = vmatprep.subr.mxu0 %v648_v31  ;;  %1079 = vmatprep.subr.mxu1 %v648_v31 }
 0x11c   :  { %v363_v52 = vmul.f32 %v1369_v30, %v346_v45  ;;  %v349_v53 = vmin.f32 %v307_v46, 0.0  ;;  %v302_v54 = vadd.f32 %v1366_v25, %v301_v49  ;;  %1052 = vmatprep.mubr.msk.f32.mxu1 %vm126_vm0, %v377_v48  ;;  %v380_v61 = vadd.f32 %v364_v50, %v331_v56  ;;  %1067 = vmatpush3.msra.mxu0 %v648_v31  ;;  %v647_v45 = vld [vmem:[#allocation10 + $0x8] sm:$0xff] }
 0x11d   :  { %v1031_v55 = vpop.f32.mrf.mxu0  ;;  %1053 = vmatmul.mubr.msk.f32.gmra.mxu1 %vm126_vm0, %v378_v47  ;;  %v333_v4 = vmax.f32 %v307_v46, 0.0  ;;  %v646_v46 = vld [vmem:[#allocation10] sm:$0xff]  ;;  %1068 = vmatprep.subr.mxu0 %v647_v45 }
 0x11e   :  { %v379_v57 = vadd.f32 %v363_v52, %v330_v51  ;;  %v317_v58 = vadd.f32 %v1031_v55, %v1366_v25  ;;  %v348_v59 = vmin.f32 %v302_v54, 0.0  ;;  %v366_v62 = vmul.f32 %v1369_v30, %v349_v53  ;;  %1083 = vmatpush3.msra.mxu1 %v648_v31  ;;  %1069 = vmatpush3.msra.mxu0 %v647_v45  ;;  %v623_v52 = vpop.permute.xlu0 %622 }
 0x11f   :  { %v311_v60 = vpop.f32.mrf.mxu0  ;;  %v332_v1 = vmax.f32 %v302_v54, 0.0  ;;  %1080 = vmatprep.subr.mxu1 %v647_v45  ;;  %1070 = vmatprep.subr.mxu0 %v646_v46 }
 0x120   :  { %v351_v63 = vmin.f32 %v317_v58, 0.0  ;;  %v312_v0 = vadd.f32 %v1366_v25, %v311_v60  ;;  %1055 = vmatprep.mubr.msk.f32.mxu1 %vm126_vm0, %v379_v57  ;;  %v365_v3 = vmul.f32 %v1369_v30, %v348_v59  ;;  %v382_v22 = vadd.f32 %v366_v62, %v333_v4  ;;  %1084 = vmatpush3.msra.mxu1 %v647_v45 }
 0x121   :  { %1056 = vmatmul.mubr.msk.f32.gmra.mxu1 %vm126_vm0, %v380_v61  ;;  %v335_v27 = vmax.f32 %v317_v58, 0.0  ;;  %1081 = vmatprep.subr.mxu1 %v646_v46  ;;  %v637_v62 = vstv %s911_s3 }
 0x122   :  { %v350_v20 = vmin.f32 %v312_v0, 0.0  ;;  %v381_v21 = vadd.f32 %v365_v3, %v332_v1  ;;  %v368_v23 = vmul.f32 %v1369_v30, %v351_v63  ;;  %v334_v24 = vmax.f32 %v312_v0, 0.0  ;;  %1071 = vmatpush3.msra.mxu0 %v646_v46  ;;  %1085 = vmatpush3.msra.mxu1 %v646_v46 }
 0x124   :  { %v367_v26 = vmul.f32 %v1369_v30, %v350_v20  ;;  %1058 = vmatprep.mubr.msk.f32.mxu1 %vm126_vm0, %v381_v21  ;;  %v384_v28 = vadd.f32 %v368_v23, %v335_v27 }
 0x125   :  { %1059 = vmatmul.mubr.msk.f32.gmra.mxu1 %vm126_vm0, %v382_v22 }
 0x126   :  { %v383_v25 = vadd.f32 %v367_v26, %v334_v24 }
 0x128   :  { %1061 = vmatprep.mubr.msk.f32.mxu1 %vm126_vm0, %v383_v25 }
 0x129   :  { %1062 = vmatmul.mubr.msk.f32.gmra.mxu1 %vm126_vm0, %v384_v28 }
 0x1cd   :  { %v1418_v30 = vpop.f32.mrf.mxu1 }
 0x1ce   :  { %v590_v55 = vsel %vm582_vm1, %v1418_v30, 0.0 }
 0x1cf   :  { %v1420_v32 = vpop.f32.mrf.mxu1 }
 0x1d0   :  { %v583_v38 = vsel %vm582_vm1, %v1420_v32, 0.0 }
 0x1d1   :  { %v1422_v33 = vpop.f32.mrf.mxu1 }
 0x1d2   :  { %v591_v51 = vsel %vm582_vm1, %v1422_v33, 0.0 }
 0x1d3   :  { %v1424_v34 = vpop.f32.mrf.mxu1  ;;  %v592_v57 = vadd.f32 %v591_v51, %v590_v55 }
 0x1d4   :  { %v584_v36 = vsel %vm582_vm1, %v1424_v34, 0.0 }
 0x1d5   :  { %v1426_v35 = vpop.f32.mrf.mxu1  ;;  %v585_v40 = vadd.f32 %v584_v36, %v583_v38 }
 0x1d6   :  { %v593_v56 = vsel %vm582_vm1, %v1426_v35, 0.0 }
 0x1d7   :  { %v1430_v37 = vpop.f32.mrf.mxu1  ;;  %v594_v63 = vadd.f32 %v593_v56, %v592_v57 }
 0x1d8   :  { %v586_v39 = vsel %vm582_vm1, %v1430_v37, 0.0 }
 0x1d9   :  { %v1436_v41 = vpop.f32.mrf.mxu1  ;;  %v587_v42 = vadd.f32 %v586_v39, %v585_v40 }
 0x1da   :  { %v595_v60 = vsel %vm582_vm1, %v1436_v41, 0.0 }
 0x1db   :  { %v1438_v43 = vpop.f32.mrf.mxu1  ;;  %v596_v22 = vadd.f32 %v595_v60, %v594_v63 }
 0x1dc   :  { %v588_v44 = vsel %vm582_vm1, %v1438_v43, 0.0 }
 0x1dd   :  { %v589_v47 = vadd.f32 %v588_v44, %v587_v42  ;;  %v1442_v48 = vpop.f32.mrf.mxu1  ;;  %v613_v38 = vmul.f32 0.25, %v596_v22 }
 0x1de   :  { %v604_v4 = vsel %vm582_vm1, %v1442_v48, 0.0 }
 0x1df   :  { %v612_v49 = vmul.f32 0.25, %v589_v47  ;;  %v1444_v50 = vpop.f32.mrf.mxu1  ;;  %v626_v47 = vadd.f32 %v623_v52, %v613_v38  ;;  %v1481_v38 = vstv %s912_s9 }
 0x1e0   :  { %v597_v27 = vsel %vm582_vm1, %v1444_v50, 0.0 }
 0x1e1   :  { %v625_v53 = vadd.f32 %v623_v52, %v612_v49  ;;  %v1448_v54 = vpop.f32.mrf.mxu1  ;;  %v634_v56 = vmin.f32 %v626_v47, 0.0 }
 0x1e2   :  { %v605_v61 = vsel %vm582_vm1, %v1448_v54, 0.0 }
 0x1e3   :  { %v633_v58 = vmin.f32 %v625_v53, 0.0  ;;  %v1454_v59 = vpop.f32.mrf.mxu1  ;;  %v629_v1 = vmax.f32 %v625_v53, 0.0  ;;  %v606_v23 = vadd.f32 %v605_v61, %v604_v4  ;;  %v639_v4 = vmul.f32 %v637_v62, %v634_v56 }
 0x1e4   :  { %v598_v20 = vsel %vm582_vm1, %v1454_v59, 0.0 }
 0x1e5   :  { %v1060_v0 = vpop.f32.mrf.mxu1  ;;  %v638_v3 = vmul.f32 %v637_v62, %v633_v58  ;;  %v599_v28 = vadd.f32 %v598_v20, %v597_v27  ;;  %v630_v20 = vmax.f32 %v626_v47, 0.0 }
 0x1e6   :  { %v607_v21 = vsel %vm582_vm1, %v1060_v0, 0.0 }
 0x1e7   :  { %v563_v24 = vpop.f32.mrf.mxu1  ;;  %v642_v26 = vadd.f32 %v638_v3, %v629_v1  ;;  %v608_v29 = vadd.f32 %v607_v21, %v606_v23  ;;  %v643_v21 = vadd.f32 %v639_v4, %v630_v20 }
 0x1e8   :  { %v600_v25 = vsel %vm582_vm1, %v563_v24, 0.0 }
 0x1e9   :  { %654 = vrot.lane.b32.xlu0 %v642_v26, %s1222_s5  ;;  %v1063_v31 = vpop.f32.mrf.mxu1  ;;  %v601_v39 = vadd.f32 %v600_v25, %v599_v28 }
 0x1ea   :  { %v609_v36 = vsel %vm582_vm1, %v1063_v31, 0.0 }
 0x1eb   :  { %v610_v40 = vadd.f32 %v609_v36, %v608_v29  ;;  %v573_v42 = vpop.f32.mrf.mxu1 }
 0x1ec   :  { %v602_v44 = vsel %vm582_vm1, %v573_v42, 0.0 }
 0x1ed   :  { %v615_v45 = vmul.f32 0.25, %v610_v40  ;;  %v603_v46 = vadd.f32 %v602_v44, %v601_v39 }
 0x1ef   :  { %v628_v49 = vadd.f32 %v623_v52, %v615_v45  ;;  %v614_v51 = vmul.f32 0.25, %v603_v46 }
 0x1f1   :  { %v636_v53 = vmin.f32 %v628_v49, 0.0  ;;  %v627_v55 = vadd.f32 %v623_v52, %v614_v51  ;;  %v632_v57 = vmax.f32 %v628_v49, 0.0 }
 0x1f3   :  { %v641_v58 = vmul.f32 %v637_v62, %v636_v53  ;;  %v635_v60 = vmin.f32 %v627_v55, 0.0  ;;  %v631_v63 = vmax.f32 %v627_v55, 0.0 }
 0x1f5   :  { %v645_v61 = vadd.f32 %v641_v58, %v632_v57  ;;  %v640_v1 = vmul.f32 %v637_v62, %v635_v60  ;;  %v1477_v62 = vld [vmem:[%s1570_s7] ss:$0 sm:$0xff]  ;;  %s1223_s7 = smov [#allocation12]  }
 0x1f6   :  { %s896_s14 = sshll.u32 %s1223_s7, 4  ;;  %s897_s14 = int_to_ptr.vmem [resolvable:$true] %s896_s14 }
 0x1f7   :  { %660 = vrot.lane.b32.xlu0 %v645_v61, %s1222_s5  ;;  %v644_v3 = vadd.f32 %v640_v1, %v631_v63  ;;  %s1184_s15 = scalar_lea.vmem %s897_s14, 2048  ;;  %p1189_p7 = scmp.lt.s32.totalorder %s897_s14, %s897_s14 }
 0x1f8   :  { %p1185_p6 = scmp.ne.s32.totalorder %s897_s14, %s1184_s15  ;;  %p1190_p8 = scmp.lt.s32.totalorder %s1184_s15, %s1184_s15 }
 0x1f9   :  { %658 = vrot.lane.b32.xlu1 %v644_v3, %s1222_s5 }
 0x1fa   :  { %p1191_p9 = por %p1190_p8, %p1189_p7 }
 0x1fc   :  { %p1192_p10 = pnand %p1191_p9, %p1185_p6 }
 0x1fd   :  { %656 = vrot.lane.b32.xlu1 %v643_v21, %s1222_s5 }
 0x25b   :  { %v655_v22 = vpop.permute.xlu0 %654 }
 0x25c   :  { %1072 = vmatprep.mubr.msk.f32.mxu0 %vm126_vm0, %v655_v22 }
 0x269   :  { %v661_v26 = vpop.permute.xlu0 %660 }
 0x26b   :  { %v659_v23 = vpop.permute.xlu1 %658 }
 0x26c   :  { %1075 = vmatprep.mubr.msk.f32.mxu1 %vm126_vm0, %v659_v23 }
 0x26d   :  { %1076 = vmatmul.mubr.msk.f32.vlgmr.msra.gmra.mxu1 %vm126_vm0, %v661_v26 }
 0x26f   :  { %v657_v52 = vpop.permute.xlu1 %656 }
 0x270   :  { %1073 = vmatmul.mubr.msk.f32.vlgmr.msra.gmra.mxu0 %vm126_vm0, %v657_v52 }
 0x32d   :  { %v1077_v27 = vpop.f32.mrf.mxu1 }
 0x32e   :  { %v764_v25 = vadd.f32 %v1077_v27, %v1442_v48  ;;  %v766_v28 = vadd.f32 %v1077_v27, %v1448_v54  ;;  %v768_v29 = vadd.f32 %v1077_v27, %v1060_v0  ;;  %v770_v36 = vadd.f32 %v1077_v27, %v1063_v31 }
 0x32f   :  { %v746_v39 = vpop.f32.mrf.mxu1 }
 0x330   :  { %v787_v40 = vadd.f32 %v1477_v62, %v764_v25  ;;  %v789_v44 = vadd.f32 %v1477_v62, %v766_v28  ;;  %v791_v45 = vadd.f32 %v1477_v62, %v768_v29  ;;  %v793_v46 = vadd.f32 %v1477_v62, %v770_v36  ;;  %v1074_v36 = vpop.f32.mrf.mxu0 }
 0x331   :  { %v763_v47 = vadd.f32 %v746_v39, %v1444_v50  ;;  %v765_v49 = vadd.f32 %v746_v39, %v1454_v59  ;;  %v767_v48 = vadd.f32 %v746_v39, %v563_v24  ;;  %v769_v51 = vadd.f32 %v746_v39, %v573_v42 }
 0x332   :  { %v803_v54 = vmax.f32 %v787_v40, 0.0  ;;  %v805_v0 = vmax.f32 %v789_v44, 0.0  ;;  %v807_v31 = vmax.f32 %v791_v45, 0.0  ;;  %v809_v53 = vmax.f32 %v793_v46, 0.0 }
 0x333   :  { %v819_v55 = vmin.f32 %v787_v40, 0.0  ;;  %v821_v56 = vmin.f32 %v789_v44, 0.0  ;;  %v823_v57 = vmin.f32 %v791_v45, 0.0  ;;  %v825_v58 = vmin.f32 %v793_v46, 0.0 }
 0x334   :  { %v786_v60 = vadd.f32 %v1477_v62, %v763_v47  ;;  %v788_v61 = vadd.f32 %v1477_v62, %v765_v49  ;;  %v790_v63 = vadd.f32 %v1477_v62, %v767_v48  ;;  %v792_v50 = vadd.f32 %v1477_v62, %v769_v51 }
 0x335   :  { %v836_v59 = vmul.f32 %v1481_v38, %v819_v55  ;;  %v838_v24 = vmul.f32 %v1481_v38, %v821_v56  ;;  %v840_v42 = vmul.f32 %v1481_v38, %v823_v57  ;;  %v842_v1 = vmul.f32 %v1481_v38, %v825_v58  ;;  %v736_v58 = vpop.f32.mrf.mxu0 }
 0x336   :  { %v802_v3 = vmax.f32 %v786_v60, 0.0  ;;  %v804_v4 = vmax.f32 %v788_v61, 0.0  ;;  %v806_v20 = vmax.f32 %v790_v63, 0.0  ;;  %v808_v21 = vmax.f32 %v792_v50, 0.0 }
 0x337   :  { %v852_v22 = vadd.f32 %v836_v59, %v803_v54  ;;  %v854_v23 = vadd.f32 %v838_v24, %v805_v0  ;;  %v856_v26 = vadd.f32 %v840_v42, %v807_v31  ;;  %v858_v52 = vadd.f32 %v842_v1, %v809_v53 }
 0x338   :  { %v818_v27 = vmin.f32 %v786_v60, 0.0  ;;  %v820_v25 = vmin.f32 %v788_v61, 0.0  ;;  %v822_v28 = vmin.f32 %v790_v63, 0.0  ;;  %v824_v29 = vmin.f32 %v792_v50, 0.0 }
 0x339   :  { %v868_v39 = vadd.f32 %v852_v22, %v1332_v13  ;;  %v870_v40 = vadd.f32 %v854_v23, %v1340_v15  ;;  %v872_v44 = vadd.f32 %v856_v26, %v1348_v17  ;;  %v874_v45 = vadd.f32 %v858_v52, %v1356_v19 }
 0x33a   :  { %v835_v46 = vmul.f32 %v1481_v38, %v818_v27  ;;  %v837_v47 = vmul.f32 %v1481_v38, %v820_v25  ;;  %v839_v49 = vmul.f32 %v1481_v38, %v822_v28  ;;  %v841_v48 = vmul.f32 %v1481_v38, %v824_v29 }
 0x33b   :  { %884 = vst.msk [vmem:[#allocation12 + $0x48] sm:$0xff] %vm126_vm0, %v868_v39  ;;  %886 = vst.msk [vmem:[#allocation12 + $0x58] sm:$0xff] %vm126_vm0, %v870_v40  ;;  %v756_v13 = vadd.f32 %v1074_v36, %v1418_v30  ;;  %v758_v15 = vadd.f32 %v1074_v36, %v1422_v33  ;;  %v760_v17 = vadd.f32 %v1074_v36, %v1426_v35 }
 0x33c   :  { %888 = vst.msk [vmem:[#allocation12 + $0x68] sm:$0xff] %vm126_vm0, %v872_v44  ;;  %890 = vst.msk [vmem:[#allocation12 + $0x78] sm:$0xff] %vm126_vm0, %v874_v45  ;;  %v762_v19 = vadd.f32 %v1074_v36, %v1436_v41  ;;  %v851_v51 = vadd.f32 %v835_v46, %v802_v3  ;;  %v853_v54 = vadd.f32 %v837_v47, %v804_v4 }
 0x33d   :  { %v855_v0 = vadd.f32 %v839_v49, %v806_v20  ;;  %v857_v31 = vadd.f32 %v841_v48, %v808_v21  ;;  %v779_v53 = vadd.f32 %v1477_v62, %v756_v13  ;;  %v781_v55 = vadd.f32 %v1477_v62, %v758_v15 }
 0x33e   :  { %v783_v56 = vadd.f32 %v1477_v62, %v760_v17  ;;  %v785_v57 = vadd.f32 %v1477_v62, %v762_v19  ;;  %v867_v30 = vadd.f32 %v851_v51, %v1326_v12  ;;  %v869_v33 = vadd.f32 %v853_v54, %v1334_v14 }
 0x33f   :  { %v871_v35 = vadd.f32 %v855_v0, %v1342_v16  ;;  %v873_v41 = vadd.f32 %v857_v31, %v1350_v18  ;;  %v795_v60 = vmax.f32 %v779_v53, 0.0  ;;  %v797_v61 = vmax.f32 %v781_v55, 0.0 }
 0x340   :  { %v799_v63 = vmax.f32 %v783_v56, 0.0  ;;  %v801_v50 = vmax.f32 %v785_v57, 0.0  ;;  %883 = vst.msk [vmem:[#allocation12 + $0x40] sm:$0xff] %vm126_vm0, %v867_v30  ;;  %885 = vst.msk [vmem:[#allocation12 + $0x50] sm:$0xff] %vm126_vm0, %v869_v33  ;;  %v811_v12 = vmin.f32 %v779_v53, 0.0  ;;  %v813_v59 = vmin.f32 %v781_v55, 0.0 }
 0x341   :  { %887 = vst.msk [vmem:[#allocation12 + $0x60] sm:$0xff] %vm126_vm0, %v871_v35  ;;  %889 = vst.msk [vmem:[#allocation12 + $0x70] sm:$0xff] %vm126_vm0, %v873_v41  ;;  %v815_v14 = vmin.f32 %v783_v56, 0.0  ;;  %v817_v24 = vmin.f32 %v785_v57, 0.0  ;;  %v755_v16 = vadd.f32 %v736_v58, %v1420_v32  ;;  %v757_v18 = vadd.f32 %v736_v58, %v1424_v34 }
 0x342   :  { %v759_v42 = vadd.f32 %v736_v58, %v1430_v37  ;;  %v761_v1 = vadd.f32 %v736_v58, %v1438_v43  ;;  %v828_v3 = vmul.f32 %v1481_v38, %v811_v12  ;;  %v830_v4 = vmul.f32 %v1481_v38, %v813_v59 }
 0x343   :  { %v832_v20 = vmul.f32 %v1481_v38, %v815_v14  ;;  %v834_v21 = vmul.f32 %v1481_v38, %v817_v24  ;;  %v778_v22 = vadd.f32 %v1477_v62, %v755_v16  ;;  %v780_v23 = vadd.f32 %v1477_v62, %v757_v18 }
 0x344   :  { %v782_v32 = vadd.f32 %v1477_v62, %v759_v42  ;;  %v784_v34 = vadd.f32 %v1477_v62, %v761_v1  ;;  %v844_v26 = vadd.f32 %v828_v3, %v795_v60  ;;  %v846_v37 = vadd.f32 %v830_v4, %v797_v61 }
 0x345   :  { %v848_v52 = vadd.f32 %v832_v20, %v799_v63  ;;  %v850_v43 = vadd.f32 %v834_v21, %v801_v50  ;;  %v810_v36 = vmin.f32 %v778_v22, 0.0  ;;  %v812_v39 = vmin.f32 %v780_v23, 0.0 }
 0x346   :  { %v860_v27 = vadd.f32 %v844_v26, %v1300_v5  ;;  %v862_v25 = vadd.f32 %v846_v37, %v1308_v7  ;;  %v814_v40 = vmin.f32 %v782_v32, 0.0  ;;  %v816_v44 = vmin.f32 %v784_v34, 0.0 }
 0x347   :  { %v864_v28 = vadd.f32 %v848_v52, %v1316_v9  ;;  %v866_v29 = vadd.f32 %v850_v43, %v1324_v11  ;;  %v794_v62 = vmax.f32 %v778_v22, 0.0  ;;  %v796_v5 = vmax.f32 %v780_v23, 0.0 }
 0x348   :  { %876 = vst.msk [vmem:[#allocation12 + $0x8] sm:$0xff] %vm126_vm0, %v860_v27  ;;  %878 = vst.msk [vmem:[#allocation12 + $0x18] sm:$0xff] %vm126_vm0, %v862_v25  ;;  %v798_v45 = vmax.f32 %v782_v32, 0.0  ;;  %v800_v7 = vmax.f32 %v784_v34, 0.0  ;;  %v827_v9 = vmul.f32 %v1481_v38, %v810_v36  ;;  %v829_v11 = vmul.f32 %v1481_v38, %v812_v39 }
 0x349   :  { %880 = vst.msk [vmem:[#allocation12 + $0x28] sm:$0xff] %vm126_vm0, %v864_v28  ;;  %882 = vst.msk [vmem:[#allocation12 + $0x38] sm:$0xff] %vm126_vm0, %v866_v29  ;;  %v831_v46 = vmul.f32 %v1481_v38, %v814_v40  ;;  %v833_v47 = vmul.f32 %v1481_v38, %v816_v44 }
 0x34a   :  { %v843_v49 = vadd.f32 %v827_v9, %v794_v62  ;;  %v845_v48 = vadd.f32 %v829_v11, %v796_v5 }
 0x34b   :  { %v847_v13 = vadd.f32 %v831_v46, %v798_v45  ;;  %v849_v15 = vadd.f32 %v833_v47, %v800_v7 }
 0x34c   :  { %v859_v17 = vadd.f32 %v843_v49, %v1296_v2  ;;  %v861_v19 = vadd.f32 %v845_v48, %v1302_v6 }
 0x34d   :  { %v863_v51 = vadd.f32 %v847_v13, %v1310_v8  ;;  %v865_v54 = vadd.f32 %v849_v15, %v1318_v10 }
 0x34e   :  { %875 = vst.msk [vmem:[#allocation12] sm:$0xff] %vm126_vm0, %v859_v17  ;;  %877 = vst.msk [vmem:[#allocation12 + $0x10] sm:$0xff] %vm126_vm0, %v861_v19 }
 0x34f   :  { %879 = vst.msk [vmem:[#allocation12 + $0x20] sm:$0xff] %vm126_vm0, %v863_v51  ;;  %881 = vst.msk [vmem:[#allocation12 + $0x30] sm:$0xff] %vm126_vm0, %v865_v54 }
 0x350   :  { %1195 = shalt.err (!%p1192_p10)
}
 0x351   :  { %902 = dma.vmem_to_hbm [thread:$0]  %s897_s14, 2048, %s1571_s8, [#allocation4], %s1216_s10, %s1216_s10, %s1217_s11  }
 0x352   :  { %1212 = dma.done.wait [#allocation4], 2048  }
 0x353   :  { %1213 = vsyncadd [#allocation4], 4294965248 }
 0x354   :  { %906 = vsyncpa [#allocation3], 1 }
 0x355   :  { %907 = vsyncpa [#allocation8], 1 }
 0x356   :  { %908 = vsyncpa [#allocation11], 1 }
 0x357   :  { %909 = vsyncpa [#allocation4], 1 }
 0x358   :  { %910 = vsyncpa [#allocation5], 1 }

</bundles_post_ra>
